<compile_context>
chip_gen: v5e
topology: v5e:2x2
jax: 0.10.0
libtpu: 0.0.40
codegen_flags: <defaults>
</compile_context>

<pallas_src>
import jax
import jax.numpy as jnp
from jax.experimental import pallas as pl
from jax.experimental.pallas import tpu as pltpu

_NEG_BIG = -1e30  # fills padded action logits so softmax assigns them zero mass


def aq_kernel(x_ref, w1_ref, b1_ref, w2_ref, b2_ref, o_ref):
    # One batch tile per grid step: two bf16 MXU matmuls with f32 accumulation,
    # VPU bias/ReLU, and a numerically stable row softmax, all VMEM-resident.
    x = x_ref[...].astype(jnp.bfloat16)                             # cast on VPU
    h = jnp.dot(x, w1_ref[...], preferred_element_type=jnp.float32) + b1_ref[...]
    h = jnp.maximum(h, 0.0).astype(jnp.bfloat16)                    # (TB, hid)
    logits = (
        jnp.dot(h, w2_ref[...], preferred_element_type=jnp.float32) + b2_ref[...]
    )                                                               # (TB, A_PAD) f32
    # Softmax over dim=1 in f32; padded action columns are ~-1e30 -> exp -> 0.
    m = jnp.max(logits, axis=1, keepdims=True)
    e = jnp.exp(logits - m)
    denom = jnp.sum(e, axis=1, keepdims=True)
    o_ref[...] = (e * pl.reciprocal(denom, approx=True)).astype(o_ref.dtype)


def aq_network_forward(x, w1, b1, w2, b2, *, block_batch=1024, min_pallas_batch=64):
    """Fused Linear(obs,64) -> ReLU -> Linear(64,n_actions) -> Softmax(dim=1)."""
    batch, obs_size = x.shape
    hidden = w1.shape[1]
    n_actions = w2.shape[1]

    # ---- tiny-batch (per-step RL) path: plain XLA fusion beats kernel overhead.
    if batch <= min_pallas_batch:
        h = jnp.maximum(x @ w1 + b1, 0.0)
        return jax.nn.softmax(h @ w2 + b2, axis=1)

    # ---- lane-dense output: pad the action dim to a full 128-lane width.
    a_pad = ((max(n_actions, 128) + 127) // 128) * 128

    # ---- batch tiling: even tile count (v7x dual-TC balance), tb multiple of 8,
    #      each tile <= block_batch.  No explicit batch padding: Pallas masks the
    #      uneven trailing block on store.
    n_pairs = max(1, pl.cdiv(batch, 2 * block_batch))
    n_tiles = 2 * n_pairs
    tb = max(8, ((pl.cdiv(batch, n_tiles) + 7) // 8) * 8)
    n_tiles = pl.cdiv(batch, tb)

    # bf16 MXU weight operands (f32 accumulation happens inside the kernel).
    w1_p = w1.astype(jnp.bfloat16)
    b1_p = b1.astype(jnp.float32)
    w2_p = jnp.pad(w2, ((0, 0), (0, a_pad - n_actions))).astype(jnp.bfloat16)
    b2_p = jnp.pad(
        b2.astype(jnp.float32),
        ((0, 0), (0, a_pad - n_actions)),
        constant_values=_NEG_BIG,
    )

    # Memory-bound kernel: advertise realistic flops / bytes so XLA overlaps
    # neighboring ops well (MXU never saturates at K=32/64).
    flops = 2 * batch * (obs_size * hidden + hidden * a_pad)
    bytes_accessed = (
        batch * obs_size * 4          # x (f32 in)
        + batch * a_pad * 2           # out (bf16)
        + obs_size * hidden * 2 + hidden * a_pad * 2   # bf16 weights
        + hidden * 4 + a_pad * 4      # biases
    )

    out = pl.pallas_call(
        aq_kernel,
        out_shape=jax.ShapeDtypeStruct((batch, a_pad), jnp.bfloat16),
        grid=(n_tiles,),
        in_specs=[
            pl.BlockSpec((tb, obs_size), lambda i: (i, 0)),      # streamed per tile
            pl.BlockSpec((obs_size, hidden), lambda i: (0, 0)),  # VMEM-resident weights
            pl.BlockSpec((1, hidden), lambda i: (0, 0)),
            pl.BlockSpec((hidden, a_pad), lambda i: (0, 0)),
            pl.BlockSpec((1, a_pad), lambda i: (0, 0)),
        ],
        out_specs=pl.BlockSpec((tb, a_pad), lambda i: (i, 0)),
        compiler_params=pltpu.CompilerParams(
            dimension_semantics=("parallel",),  # batch tiles across TCs on v7x
        ),
        cost_estimate=pl.CostEstimate(
            flops=flops,
            transcendentals=batch * a_pad,
            bytes_accessed=bytes_accessed,
        ),
    )(x.astype(jnp.float32), w1_p, b1_p, w2_p, b2_p)

    # Drop the lane-padding of the action dim (batch was never padded in HBM).
    return out[:, :n_actions]


def init_params(key, obs_size, hidden, n_actions):
    # Deterministic PyTorch-style init: U(-1/sqrt(fan_in), 1/sqrt(fan_in)).
    k1, k2, k3, k4 = jax.random.split(key, 4)
    bound1 = 1.0 / jnp.sqrt(jnp.float32(obs_size))
    bound2 = 1.0 / jnp.sqrt(jnp.float32(hidden))
    w1 = jax.random.uniform(k1, (obs_size, hidden), jnp.float32, -bound1, bound1)
    b1 = jax.random.uniform(k2, (1, hidden), jnp.float32, -bound1, bound1)
    w2 = jax.random.uniform(k3, (hidden, n_actions), jnp.float32, -bound2, bound2)
    b2 = jax.random.uniform(k4, (1, n_actions), jnp.float32, -bound2, bound2)
    return w1, b1, w2, b2


def reference_forward(x, w1, b1, w2, b2):
    h = jnp.maximum(x @ w1 + b1, 0.0)
    return jax.nn.softmax(h @ w2 + b2, axis=1)


if __name__ == "__main__":
    obs_size, hidden, n_actions = 32, 64, 8

    key = jax.random.PRNGKey(0)
    kx, kp, kx2 = jax.random.split(key, 3)
    w1, b1, w2, b2 = init_params(kp, obs_size, hidden, n_actions)

    # Small per-step shape (typical RL inference call) -> fused XLA bypass path.
    batch = 8
    x = jax.random.normal(kx, (batch, obs_size), jnp.float32)
    out = jax.block_until_ready(aq_network_forward(x, w1, b1, w2, b2))
    ref = reference_forward(x, w1, b1, w2, b2)
    assert out.shape == (batch, n_actions)
    assert jnp.allclose(out, ref, atol=1e-5), float(jnp.max(jnp.abs(out - ref)))
    assert jnp.allclose(jnp.sum(out, axis=1), 1.0, atol=1e-5)

    # Throughput / ragged-batch path: exercises the Pallas kernel, even tile
    # count, the masked uneven trailing block, and the bf16 output store.
    batch2 = 200
    x2 = jax.random.normal(kx2, (batch2, obs_size), jnp.float32)
    out2 = jax.block_until_ready(aq_network_forward(x2, w1, b1, w2, b2))
    ref2 = reference_forward(x2, w1, b1, w2, b2)
    assert out2.shape == (batch2, n_actions)
    out2_f32 = out2.astype(jnp.float32)
    # bf16 matmul operands + bf16 output store + approx reciprocal -> loose tol.
    assert jnp.allclose(out2_f32, ref2, atol=2e-2), float(
        jnp.max(jnp.abs(out2_f32 - ref2))
    )
    assert jnp.allclose(jnp.sum(out2_f32, axis=1), 1.0, atol=2e-2)

    print("KERNEL_OK")
</pallas_src>

<mosaic_0001>
module attributes {stable_mosaic.version = 11 : i64} {
  func.func @aq_kernel(%arg0: i32, %arg1: memref<104x32xf32, #tpu.memory_space<vmem>>, %arg2: memref<32x64xbf16, #tpu.memory_space<vmem>>, %arg3: memref<1x64xf32, #tpu.memory_space<vmem>>, %arg4: memref<64x128xbf16, #tpu.memory_space<vmem>>, %arg5: memref<1x128xf32, #tpu.memory_space<vmem>>, %arg6: memref<104x128xbf16, #tpu.memory_space<vmem>>) attributes {dimension_semantics = [#tpu.dimension_semantics<parallel>], iteration_bounds = array<i64: 2>, scalar_prefetch = 0 : i64, scratch_operands = 0 : i64, tpu.core_type = #tpu.core_type<tc>, window_params = [{transform_indices = @transform_0, window_bounds = array<i64: 104, 32>}, {pipeline_mode = #tpu.pipeline_mode<synchronous>, transform_indices = @transform_1, window_bounds = array<i64: 32, 64>}, {pipeline_mode = #tpu.pipeline_mode<synchronous>, transform_indices = @transform_2, window_bounds = array<i64: 1, 64>}, {pipeline_mode = #tpu.pipeline_mode<synchronous>, transform_indices = @transform_3, window_bounds = array<i64: 64, 128>}, {pipeline_mode = #tpu.pipeline_mode<synchronous>, transform_indices = @transform_4, window_bounds = array<i64: 1, 128>}, {transform_indices = @transform_5, window_bounds = array<i64: 104, 128>}]} {
    %c0 = arith.constant 0 : index
    %c0_0 = arith.constant 0 : index
    %0 = vector.load %arg1[%c0, %c0_0] : memref<104x32xf32, #tpu.memory_space<vmem>>, vector<104x32xf32>
    %1 = arith.truncf %0 : vector<104x32xf32> to vector<104x32xbf16>
    %c0_1 = arith.constant 0 : index
    %c0_2 = arith.constant 0 : index
    %2 = vector.load %arg2[%c0_1, %c0_2] : memref<32x64xbf16, #tpu.memory_space<vmem>>, vector<32x64xbf16>
    %cst = arith.constant dense<0.000000e+00> : vector<104x64xf32>
    %3 = tpu.matmul %1, %2, %cst {dimension_numbers = #tpu.dot_dimension_numbers<[1], [0], [0], [1], [0, 0, 1, 1], [], []>} : vector<104x32xbf16>, vector<32x64xbf16>, vector<104x64xf32> -> vector<104x64xf32>
    %c0_3 = arith.constant 0 : index
    %c0_4 = arith.constant 0 : index
    %4 = vector.load %arg3[%c0_3, %c0_4] : memref<1x64xf32, #tpu.memory_space<vmem>>, vector<1x64xf32>
    %5 = vector.broadcast %4 : vector<1x64xf32> to vector<104x64xf32>
    %6 = arith.addf %3, %5 : vector<104x64xf32>
    %cst_5 = arith.constant 0.000000e+00 : f32
    %7 = vector.broadcast %cst_5 : f32 to vector<104x64xf32>
    %8 = arith.maximumf %6, %7 : vector<104x64xf32>
    %9 = arith.truncf %8 : vector<104x64xf32> to vector<104x64xbf16>
    %c0_6 = arith.constant 0 : index
    %c0_7 = arith.constant 0 : index
    %10 = vector.load %arg4[%c0_6, %c0_7] : memref<64x128xbf16, #tpu.memory_space<vmem>>, vector<64x128xbf16>
    %cst_8 = arith.constant dense<0.000000e+00> : vector<104x128xf32>
    %11 = tpu.matmul %9, %10, %cst_8 {dimension_numbers = #tpu.dot_dimension_numbers<[1], [0], [0], [1], [0, 0, 1, 1], [], []>} : vector<104x64xbf16>, vector<64x128xbf16>, vector<104x128xf32> -> vector<104x128xf32>
    %c0_9 = arith.constant 0 : index
    %c0_10 = arith.constant 0 : index
    %12 = vector.load %arg5[%c0_9, %c0_10] : memref<1x128xf32, #tpu.memory_space<vmem>>, vector<1x128xf32>
    %13 = vector.broadcast %12 : vector<1x128xf32> to vector<104x128xf32>
    %14 = arith.addf %11, %13 : vector<104x128xf32>
    %cst_11 = arith.constant dense<0xFF800000> : vector<104xf32>
    %15 = vector.multi_reduction <maximumf>, %14, %cst_11 [1] : vector<104x128xf32> to vector<104xf32>
    %16 = vector.shape_cast %15 : vector<104xf32> to vector<104x1xf32>
    %17 = vector.broadcast %16 : vector<104x1xf32> to vector<104x128xf32>
    %18 = arith.subf %14, %17 : vector<104x128xf32>
    %19 = math.exp %18 : vector<104x128xf32>
    %cst_12 = arith.constant dense<0.000000e+00> : vector<104xf32>
    %20 = vector.multi_reduction <add>, %19, %cst_12 [1] : vector<104x128xf32> to vector<104xf32>
    %21 = vector.shape_cast %20 : vector<104xf32> to vector<104x1xf32>
    %22 = tpu.reciprocal %21 {approx = true} : vector<104x1xf32> -> vector<104x1xf32>
    %23 = vector.broadcast %22 : vector<104x1xf32> to vector<104x128xf32>
    %24 = arith.mulf %19, %23 : vector<104x128xf32>
    %25 = arith.truncf %24 : vector<104x128xf32> to vector<104x128xbf16>
    %c0_13 = arith.constant 0 : index
    %c0_14 = arith.constant 0 : index
    %26 = vector.load %arg6[%c0_13, %c0_14] : memref<104x128xbf16, #tpu.memory_space<vmem>>, vector<104x128xbf16>
    tpu.vector_store %arg6[%c0_13, %c0_14], %25 {strides = array<i32>} : memref<104x128xbf16, #tpu.memory_space<vmem>>, vector<104x128xbf16>,
    return
  }
  func.func @transform_0(%arg0: i32) -> (i32, i32) {
    %c0_i32 = arith.constant 0 : i32
    %c0_i32_0 = arith.constant 0 : i32
    return %arg0, %c0_i32 : i32, i32
  }
  func.func @transform_1(%arg0: i32) -> (i32, i32) {
    %c0_i32 = arith.constant 0 : i32
    %c0_i32_0 = arith.constant 0 : i32
    %c0_i32_1 = arith.constant 0 : i32
    return %c0_i32, %c0_i32_0 : i32, i32
  }
  func.func @transform_2(%arg0: i32) -> (i32, i32) {
    %c0_i32 = arith.constant 0 : i32
    %c0_i32_0 = arith.constant 0 : i32
    %c0_i32_1 = arith.constant 0 : i32
    return %c0_i32, %c0_i32_0 : i32, i32
  }
  func.func @transform_3(%arg0: i32) -> (i32, i32) {
    %c0_i32 = arith.constant 0 : i32
    %c0_i32_0 = arith.constant 0 : i32
    %c0_i32_1 = arith.constant 0 : i32
    return %c0_i32, %c0_i32_0 : i32, i32
  }
  func.func @transform_4(%arg0: i32) -> (i32, i32) {
    %c0_i32 = arith.constant 0 : i32
    %c0_i32_0 = arith.constant 0 : i32
    %c0_i32_1 = arith.constant 0 : i32
    return %c0_i32, %c0_i32_0 : i32, i32
  }
  func.func @transform_5(%arg0: i32) -> (i32, i32) {
    %c0_i32 = arith.constant 0 : i32
    %c0_i32_0 = arith.constant 0 : i32
    return %arg0, %c0_i32 : i32, i32
  }
}

</mosaic_0001>

<bundles_post_ra>
// kernel: tpu_custom_call.1
= control target key start
LH: loop header
LB: loop body
LE: loop exit
PB: predicated region body
PF: predicated region fallthrough
CT: control target
= control target key end

     0   :  { %10 = vsyncpa [#allocation3], 0  ;;  %s1239_s0 = inlined_call_operand.vmem [shape: f32[200,32], index: 0, kind: input, shape index: {}]   ;;  %s1240_s1 = inlined_call_operand.vmem [shape: bf16[32,64], index: 1, kind: input, shape index: {}]   ;;  %s1241_s2 = inlined_call_operand.vmem [shape: f32[1,64], index: 2, kind: input, shape index: {}]   ;;  %s1242_s3 = inlined_call_operand.vmem [shape: bf16[64,128], index: 3, kind: input, shape index: {}]   ;;  %s1243_s4 = inlined_call_operand.vmem [shape: f32[1,128], index: 4, kind: input, shape index: {}]   ;;  %s1244_s5 = inlined_call_operand.hbm [shape: bf16[200,128], index: 5, kind: output, shape index: {}]  }
   0x1   :  { %12 = vsyncpa [#allocation3 + $0x1], 0  ;;  %s1006_s18 = smov 0   ;;  %s1008_s19 = smov 0  }
   0x2   :  { %s1010_s20 = smov 0   ;;  %s1012_s21 = smov 0  }
   0x3 LB: > { %s1027_s22 = sadd.s32 4294967295, %s971_s21   ;;  %s705_s23 = sadd.s32 4294967294, %s971_s21   ;;  %s971_s21 = sphi %s1012_s21, %s1251_s21   ;;  %s967_s20 = sphi %s1010_s20, %s1250_s20   ;;  %s963_s19 = sphi %s1008_s19, %s1249_s19   ;;  %s959_s18 = sphi %s1006_s18, %s1248_s18  }
   0x4   : > { %s1031_s24 = sadd.s32 1, %s971_s21   ;;  %s135_s25 = sadd.s32 1, %s967_s20 }
   0x5   : > { %s132_s26 = ssub.s32 %s971_s21, %s1031_s24  ;;  %p145_p0 = scmp.ne.s32.totalorder %s967_s20, %s963_s19 }
   0x6   : > { %p133_p1 = scmp.eq.s32.totalorder %s132_s26, 0  ;;  %p146_p2 = scmp.eq.s32.totalorder %s1027_s22, 1 }
   0x7   : > { %p151_p3 = scmp.ne.s32.totalorder %s963_s19, %s959_s18  ;;  %p152_p4 = scmp.eq.s32.totalorder %s705_s23, 1 }
   0x8   : > { %s1042_s27 = scalar_select %p133_p1, %s967_s20, %s135_s25  }
   0x9   : > { %p1044_p5 = por %p146_p2, %p145_p0  ;;  %p1048_p6 = por %p152_p4, %p151_p3 }
   0xa   : > { %p708_p7 = scmp.ge.s32.totalorder %s971_s21, 1  ;;  %p199_p8 = scmp.lt.s32.totalorder %s971_s21, 3 }
   0xc   : > { %p200_p9 = pnand %p708_p7, %p199_p8 }
   0xd   : > { %s1058_s7 = smul.u32 (!%p200_p9), 13, %s1027_s22  ;;  %s228_s12 = sand.u32 (!%p200_p9), 1, %s963_s19  }
   0xe   : > { %203 = sbr.rel (%p200_p9) target bundleno = 645 (0x285), region = 40  ;;  %s1178_s15 = scalar_lea.sflag (!%p200_p9), [#allocation3], %s228_s12 }
   0xf   : > { %p236_p10 = scmp.lt.s32.totalorder (!%p200_p9), %s1058_s7, 24  ;;  %s803_s13 = smul.u32 (!%p200_p9), 52, %s228_s12 }
  0x13   : > { %v756_v0 = vld [vmem:[%s1240_s1 + $0x8] sm:$0xff]  ;;  %v755_v1 = vld [vmem:[%s1240_s1] sm:$0xff]  ;;  %s237_s10 = scalar_select %p236_p10, %s1058_s7, 24  ;;  %vm291_vm0 = vcmask 261120   ;;  %v760_v22 = vld [vmem:[%s1242_s3 + $0x18] sm:$0xff]  ;;  %vm412_vm1 = vcmask 523264  }
  0x14   : > { %319 = vmatpush.bf16.msra.mxu0 %v756_v0  ;;  %797 = vmatpush.bf16.msra.mxu3 %v756_v0  ;;  %v759_v23 = vld [vmem:[%s1242_s3 + $0x10] sm:$0xff]  ;;  %v758_v24 = vld [vmem:[%s1242_s3 + $0x8] sm:$0xff]  ;;  %v757_v25 = vld [vmem:[%s1242_s3] sm:$0xff]  ;;  %s629_s16 = ssub.s32 (%p1044_p5), 25, %s1058_s7 }
  0x15   : > { %s709_s11 = sshll.u32 %s237_s10, 3  ;;  %438 = vmatpush.bf16.msra.mxu1 %v760_v22  ;;  %799 = vmatpush.bf16.msra.mxu2 %v760_v22  ;;  %v844_v27 = vld [vmem:[%s1241_s2] ss:$0 sm:$0xff]  ;;  %p630_p11 = scmp.lt.s32.totalorder (%p1044_p5), %s629_s16, 13 }
  0x16   : > { %s239_s14 = scalar_lea.vmem %s1239_s0, %s709_s11 }
  0x17   : > { %v251_v2 = vld [vmem:[%s239_s14] sm:$0xff]  ;;  %v252_v3 = vld [vmem:[%s239_s14 + $0x8] sm:$0xff]  ;;  %v253_v8 = vld [vmem:[%s239_s14 + $0x10] sm:$0xff] }
  0x18   : > { %320 = vmatpush.bf16.msra.mxu0 %v755_v1  ;;  %798 = vmatpush.bf16.msra.mxu3 %v755_v1  ;;  %v259_v4 = vld [vmem:[%s239_s14 + $0x40] sm:$0xff]  ;;  %v264_v5 = vpack.c.bf16 %v252_v3, %v251_v2  ;;  %v260_v6 = vld [vmem:[%s239_s14 + $0x48] sm:$0xff]  ;;  %v254_v9 = vld [vmem:[%s239_s14 + $0x18] sm:$0xff] }
  0x19   : > { %v268_v7 = vpack.c.bf16 %v260_v6, %v259_v4  ;;  %v261_v10 = vld [vmem:[%s239_s14 + $0x50] sm:$0xff]  ;;  %v262_v11 = vld [vmem:[%s239_s14 + $0x58] sm:$0xff]  ;;  %v265_v12 = vpack.c.bf16 %v254_v9, %v253_v8  ;;  %v255_v14 = vld [vmem:[%s239_s14 + $0x20] sm:$0xff]  ;;  %439 = vmatpush.bf16.msra.mxu1 %v759_v23  ;;  %800 = vmatpush.bf16.msra.mxu2 %v759_v23 }
  0x1a   : > { %v269_v13 = vpack.c.bf16 %v262_v11, %v261_v10  ;;  %v256_v15 = vld [vmem:[%s239_s14 + $0x28] sm:$0xff]  ;;  %v263_v16 = vld [vmem:[%s239_s14 + $0x60] sm:$0xff]  ;;  %v257_v19 = vld [vmem:[%s239_s14 + $0x30] sm:$0xff] }
  0x1b   : > { %718 = vmatmul.msk.bf16.vlgmr.msra.gmra.mxu0 %vm291_vm0, %v264_v5  ;;  %722 = vmatmul.msk.bf16.vlgmr.msra.gmra.mxu3 %vm291_vm0, %v268_v7  ;;  %v266_v17 = vpack.c.bf16 %v256_v15, %v255_v14  ;;  %v270_v18 = vpack.c.bf16 %v263_v16, %v263_v16  ;;  %v258_v20 = vld [vmem:[%s239_s14 + $0x38] sm:$0xff]  ;;  %v845_v10 = vld [vmem:[%s1243_s4] ss:$0 sm:$0xff]  ;;  %s1158_s14 = scalar_lea.vmem [#allocation2], %s803_s13 }
  0x1c   : > { %v267_v21 = vpack.c.bf16 %v258_v20, %v257_v19 }
  0x1d   : > { %440 = vmatpush.bf16.msra.mxu1 %v758_v24  ;;  %801 = vmatpush.bf16.msra.mxu2 %v758_v24 }
  0x21   : > { %441 = vmatpush.bf16.msra.mxu1 %v757_v25  ;;  %802 = vmatpush.bf16.msra.mxu2 %v757_v25 }
  0x2b   : > { %719 = vmatmul.msk.bf16.gmra.mxu0 %vm291_vm0, %v265_v12  ;;  %723 = vmatmul.msk.bf16.gmra.mxu3 %vm291_vm0, %v269_v13 }
  0x3b   : > { %720 = vmatmul.msk.bf16.gmra.mxu0 %vm291_vm0, %v266_v17  ;;  %724 = vmatmul.msk.bf16.gmra.mxu3 %vm291_vm0, %v270_v18 }
  0x4b   : > { %721 = vmatmul.msk.bf16.gmra.mxu0 %vm291_vm0, %v267_v21 }
  0x98   : > { %v322_v26 = vpop.f32.mrf.mxu0 }
  0x99   : > { %v323_v28 = vadd.f32 %v844_v27, %v322_v26 }
  0x9b   : > { %v356_v32 = vmax.f32 %v323_v28, 0.0 }
  0x9e   : > { %v342_v29 = vpop.f32.mrf.mxu3 }
  0x9f   : > { %v343_v34 = vadd.f32 %v844_v27, %v342_v29 }
  0xa0   : > { %v324_v30 = vpop.f32.mrf.mxu0 }
  0xa1   : > { %v325_v31 = vadd.f32 %v844_v27, %v324_v30  ;;  %v364_v37 = vmax.f32 %v343_v34, 0.0 }
  0xa3   : > { %v357_v33 = vmax.f32 %v325_v31, 0.0 }
  0xa5   : > { %v369_v35 = vpack.c.bf16 %v357_v33, %v356_v32 }
  0xa6   : > { %v344_v36 = vpop.f32.mrf.mxu3 }
  0xa7   : > { %741 = vmatmul.msk.bf16.vlgmr.msra.gmra.mxu1 %vm412_vm1, %v369_v35  ;;  %v345_v38 = vadd.f32 %v844_v27, %v344_v36 }
  0xa8   : > { %v327_v39 = vpop.f32.mrf.mxu0 }
  0xa9   : > { %v365_v40 = vmax.f32 %v345_v38, 0.0  ;;  %v328_v42 = vadd.f32 %v844_v27, %v327_v39 }
  0xab   : > { %v373_v41 = vpack.c.bf16 %v365_v40, %v364_v37  ;;  %v358_v46 = vmax.f32 %v328_v42, 0.0 }
  0xad   : > { %745 = vmatmul.msk.bf16.vlgmr.msra.gmra.mxu2 %vm412_vm1, %v373_v41 }
  0xae   : > { %v347_v43 = vpop.f32.mrf.mxu3 }
  0xaf   : > { %v348_v48 = vadd.f32 %v844_v27, %v347_v43 }
  0xb0   : > { %v329_v44 = vpop.f32.mrf.mxu0 }
  0xb1   : > { %v330_v45 = vadd.f32 %v844_v27, %v329_v44  ;;  %v366_v51 = vmax.f32 %v348_v48, 0.0 }
  0xb3   : > { %v359_v47 = vmax.f32 %v330_v45, 0.0 }
  0xb5   : > { %v370_v49 = vpack.c.bf16 %v359_v47, %v358_v46 }
  0xb6   : > { %v349_v50 = vpop.f32.mrf.mxu3 }
  0xb7   : > { %742 = vmatmul.msk.bf16.gmra.mxu1 %vm412_vm1, %v370_v49  ;;  %v350_v53 = vadd.f32 %v844_v27, %v349_v50 }
  0xb8   : > { %v332_v52 = vpop.f32.mrf.mxu0 }
  0xb9   : > { %v367_v54 = vmax.f32 %v350_v53, 0.0  ;;  %v333_v56 = vadd.f32 %v844_v27, %v332_v52 }
  0xbb   : > { %v374_v55 = vpack.c.bf16 %v367_v54, %v366_v51  ;;  %v360_v61 = vmax.f32 %v333_v56, 0.0 }
  0xbd   : > { %746 = vmatmul.msk.bf16.gmra.mxu2 %vm412_vm1, %v374_v55 }
  0xbe   : > { %v352_v57 = vpop.f32.mrf.mxu3 }
  0xbf   : > { %v353_v60 = vadd.f32 %v844_v27, %v352_v57 }
  0xc0   : > { %v334_v58 = vpop.f32.mrf.mxu0 }
  0xc1   : > { %v335_v59 = vadd.f32 %v844_v27, %v334_v58  ;;  %v368_v0 = vmax.f32 %v353_v60, 0.0 }
  0xc3   : > { %v361_v62 = vmax.f32 %v335_v59, 0.0  ;;  %v375_v3 = vpack.c.bf16 %v368_v0, %v368_v0 }
  0xc5   : > { %v371_v63 = vpack.c.bf16 %v361_v62, %v360_v61 }
  0xc6   : > { %v354_v1 = vpop.f32.mrf.mxu3 }
  0xc7   : > { %743 = vmatmul.msk.bf16.gmra.mxu1 %vm412_vm1, %v371_v63 }
  0xc8   : > { %v337_v2 = vpop.f32.mrf.mxu0 }
  0xc9   : > { %v338_v4 = vadd.f32 %v844_v27, %v337_v2 }
  0xcb   : > { %v362_v7 = vmax.f32 %v338_v4, 0.0 }
  0xcd   : > { %747 = vmatmul.msk.bf16.gmra.mxu2 %vm412_vm1, %v375_v3 }
  0xd0   : > { %v339_v5 = vpop.f32.mrf.mxu0 }
  0xd1   : > { %v340_v6 = vadd.f32 %v844_v27, %v339_v5 }
  0xd3   : > { %v363_v8 = vmax.f32 %v340_v6, 0.0 }
  0xd5   : > { %v372_v9 = vpack.c.bf16 %v363_v8, %v362_v7 }
  0xd7   : > { %744 = vmatmul.msk.bf16.gmra.mxu1 %vm412_vm1, %v372_v9 }
 0x124   : > { %v443_v11 = vpop.f32.mrf.mxu1 }
 0x125   : > { %v444_v12 = vadd.f32 %v845_v10, %v443_v11 }
 0x127   : > { %477 = vmax.xlane.f32.xlu0 %v444_v12 }
 0x12c   : > { %v445_v13 = vpop.f32.mrf.mxu1 }
 0x12d   : > { %v446_v14 = vadd.f32 %v845_v10, %v445_v13 }
 0x12f   : > { %479 = vmax.xlane.f32.xlu0 %v446_v14 }
 0x130   : > { %v463_v15 = vpop.f32.mrf.mxu2 }
 0x131   : > { %v464_v16 = vadd.f32 %v845_v10, %v463_v15 }
 0x133   : > { %493 = vmax.xlane.f32.xlu2 %v464_v16 }
 0x134   : > { %v448_v17 = vpop.f32.mrf.mxu1 }
 0x135   : > { %v449_v18 = vadd.f32 %v845_v10, %v448_v17 }
 0x137   : > { %481 = vmax.xlane.f32.xlu1 %v449_v18 }
 0x138   : > { %v465_v19 = vpop.f32.mrf.mxu2 }
 0x139   : > { %v466_v20 = vadd.f32 %v845_v10, %v465_v19 }
 0x13b   : > { %495 = vmax.xlane.f32.xlu0 %v466_v20 }
 0x13c   : > { %v450_v21 = vpop.f32.mrf.mxu1 }
 0x13d   : > { %v451_v22 = vadd.f32 %v845_v10, %v450_v21 }
 0x13f   : > { %483 = vmax.xlane.f32.xlu1 %v451_v22 }
 0x140   : > { %v468_v23 = vpop.f32.mrf.mxu2 }
 0x141   : > { %v1112_v37 = vadd.f32 %v845_v10, %v468_v23 }
 0x144   : > { %v453_v24 = vpop.f32.mrf.mxu1 }
 0x145   : > { %v454_v25 = vadd.f32 %v845_v10, %v453_v24 }
 0x147   : > { %485 = vmax.xlane.f32.xlu2 %v454_v25 }
 0x148   : > { %v470_v26 = vpop.f32.mrf.mxu2 }
 0x149   : > { %v1100_v31 = vadd.f32 %v845_v10, %v470_v26 }
 0x14c   : > { %v455_v27 = vpop.f32.mrf.mxu1 }
 0x14d   : > { %v456_v28 = vadd.f32 %v845_v10, %v455_v27 }
 0x14f   : > { %487 = vmax.xlane.f32.xlu2 %v456_v28 }
 0x150   : > { %v473_v29 = vpop.f32.mrf.mxu2 }
 0x151   : > { %v1106_v34 = vadd.f32 %v845_v10, %v473_v29 }
 0x154   : > { %v458_v30 = vpop.f32.mrf.mxu1 }
 0x155   : > { %v1102_v32 = vadd.f32 %v845_v10, %v458_v30 }
 0x157   : > { %499 = vmax.xlane.f32.xlu2 %v1100_v31  ;;  %489 = vmax.xlane.f32.xlu0 %v1102_v32 }
 0x158   : > { %v475_v33 = vpop.f32.mrf.mxu2 }
 0x15c   : > { %v460_v35 = vpop.f32.mrf.mxu1 }
 0x15d   : > { %v1108_v36 = vadd.f32 %v845_v10, %v460_v35 }
 0x15f   : > { %491 = vmax.xlane.f32.xlu1 %v1108_v36  ;;  %501 = vmax.xlane.f32.xlu0 %v1106_v34 }
 0x167   : > { %497 = vmax.xlane.f32.xlu1 %v1112_v37 }
 0x19a   : > { %v478_v38 = vpop.xlane.xlu0 %477 }
 0x19b   : > { %v503_v39 = vsub.f32 %v444_v12, %v478_v38 }
 0x19d   : > { %v516_v40 = vmul.f32 1.442695, %v503_v39 }
 0x19f   : > { %846 = vpow2.f32 %v516_v40 }
 0x1a2   : > { %v480_v41 = vpop.xlane.xlu0 %479 }
 0x1a3   : > { %v504_v42 = vsub.f32 %v446_v14, %v480_v41 }
 0x1a5   : > { %v1115_v43 = vpop.eup %846  ;;  %v518_v44 = vmul.f32 1.442695, %v504_v42 }
 0x1a6   : > { %542 = vadd.xlane.f32.xlu1 %v1115_v43  ;;  %v494_v45 = vpop.xlane.xlu2 %493 }
 0x1a7   : > { %848 = vpow2.f32 %v518_v44  ;;  %v511_v46 = vsub.f32 %v464_v16, %v494_v45 }
 0x1a9   : > { %v532_v47 = vmul.f32 1.442695, %v511_v46 }
 0x1aa   : > { %v482_v48 = vpop.xlane.xlu1 %481 }
 0x1ab   : > { %v505_v49 = vsub.f32 %v449_v18, %v482_v48  ;;  %850 = vpow2.f32 %v532_v47 }
 0x1ad   : > { %v1119_v50 = vpop.eup %848  ;;  %v520_v51 = vmul.f32 1.442695, %v505_v49 }
 0x1ae   : > { %544 = vadd.xlane.f32.xlu2 %v1119_v50  ;;  %v496_v52 = vpop.xlane.xlu0 %495 }
 0x1af   : > { %v512_v53 = vsub.f32 %v466_v20, %v496_v52  ;;  %852 = vpow2.f32 %v520_v51 }
 0x1b1   : > { %v1122_v54 = vpop.eup %850  ;;  %v534_v55 = vmul.f32 1.442695, %v512_v53 }
 0x1b2   : > { %v484_v56 = vpop.xlane.xlu1 %483  ;;  %558 = vadd.xlane.f32.xlu0 %v1122_v54 }
 0x1b3   : > { %854 = vpow2.f32 %v534_v55  ;;  %v506_v57 = vsub.f32 %v451_v22, %v484_v56 }
 0x1b5   : > { %v522_v58 = vmul.f32 1.442695, %v506_v57  ;;  %v1125_v59 = vpop.eup %852 }
 0x1b7   : > { %856 = vpow2.f32 %v522_v58 }
 0x1b9   : > { %v1127_v60 = vpop.eup %854 }
 0x1ba   : > { %v486_v61 = vpop.xlane.xlu2 %485  ;;  %546 = vadd.xlane.f32.xlu0 %v1125_v59  ;;  %560 = vadd.xlane.f32.xlu1 %v1127_v60 }
 0x1bb   : > { %v507_v62 = vsub.f32 %v454_v25, %v486_v61 }
 0x1bd   : > { %v524_v63 = vmul.f32 1.442695, %v507_v62  ;;  %v1131_v0 = vpop.eup %856 }
 0x1bf   : > { %858 = vpow2.f32 %v524_v63 }
 0x1c2   : > { %v488_v1 = vpop.xlane.xlu2 %487  ;;  %548 = vadd.xlane.f32.xlu1 %v1131_v0 }
 0x1c3   : > { %v508_v2 = vsub.f32 %v456_v28, %v488_v1 }
 0x1c5   : > { %v1134_v3 = vpop.eup %858  ;;  %v526_v4 = vmul.f32 1.442695, %v508_v2 }
 0x1c6   : > { %550 = vadd.xlane.f32.xlu2 %v1134_v3 }
 0x1c7   : > { %860 = vpow2.f32 %v526_v4 }
 0x1ca   : > { %v500_v5 = vpop.xlane.xlu2 %499  ;;  %v490_v6 = vpop.xlane.xlu0 %489 }
 0x1cb   : > { %v514_v7 = vsub.f32 %v1100_v31, %v500_v5  ;;  %v509_v8 = vsub.f32 %v1102_v32, %v490_v6 }
 0x1cd   : > { %v1139_v9 = vpop.eup %860  ;;  %v538_v10 = vmul.f32 1.442695, %v514_v7  ;;  %v528_v11 = vmul.f32 1.442695, %v509_v8 }
 0x1ce   : > { %552 = vadd.xlane.f32.xlu0 %v1139_v9 }
 0x1cf   : > { %862 = vpow2.f32 %v538_v10 }
 0x1d0   : > { %864 = vpow2.f32 %v528_v11 }
 0x1d2   : > { %v492_v12 = vpop.xlane.xlu1 %491  ;;  %v502_v13 = vpop.xlane.xlu0 %501 }
 0x1d3   : > { %v510_v14 = vsub.f32 %v1108_v36, %v492_v12  ;;  %v515_v15 = vsub.f32 %v1106_v34, %v502_v13 }
 0x1d5   : > { %v1144_v16 = vpop.eup %862  ;;  %v530_v17 = vmul.f32 1.442695, %v510_v14  ;;  %v540_v18 = vmul.f32 1.442695, %v515_v15 }
 0x1d6   : > { %v1146_v19 = vpop.eup %864  ;;  %564 = vadd.xlane.f32.xlu0 %v1144_v16 }
 0x1d7   : > { %866 = vpow2.f32 %v530_v17  ;;  %554 = vadd.xlane.f32.xlu1 %v1146_v19 }
 0x1d8   : > { %868 = vpow2.f32 %v540_v18 }
 0x1da   : > { %v498_v20 = vpop.xlane.xlu1 %497 }
 0x1db   : > { %v513_v21 = vsub.f32 %v1112_v37, %v498_v20 }
 0x1dd   : > { %v867_v22 = vpop.eup %866  ;;  %v536_v23 = vmul.f32 1.442695, %v513_v21 }
 0x1de   : > { %v869_v24 = vpop.eup %868  ;;  %556 = vadd.xlane.f32.xlu2 %v867_v22 }
 0x1df   : > { %870 = vpow2.f32 %v536_v23  ;;  %566 = vadd.xlane.f32.xlu1 %v869_v24 }
 0x1e5   : > { %v1151_v25 = vpop.eup %870 }
 0x1e6   : > { %562 = vadd.xlane.f32.xlu2 %v1151_v25 }
 0x219   : > { %v543_v26 = vpop.xlane.xlu1 %542 }
 0x21a   : > { %872 = vrcp.f32 %v543_v26 }
 0x220   : > { %v873_v28 = vpop.eup %872 }
 0x221   : > { %v545_v27 = vpop.xlane.xlu2 %544  ;;  %v581_v31 = vmul.f32 %v873_v28, %v1115_v43 }
 0x222   : > { %874 = vrcp.f32 %v545_v27 }
 0x225   : > { %v559_v30 = vpop.xlane.xlu0 %558 }
 0x226   : > { %876 = vrcp.f32 %v559_v30 }
 0x228   : > { %v875_v29 = vpop.eup %874 }
 0x229   : > { %v582_v32 = vmul.f32 %v875_v29, %v1119_v50 }
 0x22b   : > { %v765_v33 = vpack.c.bf16 %v582_v32, %v581_v31 }
 0x22c   : > { %v877_v36 = vpop.eup %876 }
 0x22d   : > { %766 = vst [vmem:[%s1158_s14] sm:$0xff] %v765_v33   ;;  %v561_v34 = vpop.xlane.xlu1 %560  ;;  %v547_v35 = vpop.xlane.xlu0 %546  ;;  %v589_v38 = vmul.f32 %v877_v36, %v1122_v54 }
 0x22e   : > { %878 = vrcp.f32 %v561_v34 }
 0x22f   : > { %880 = vrcp.f32 %v547_v35 }
 0x234   : > { %v879_v37 = vpop.eup %878 }
 0x235   : > { %v590_v39 = vmul.f32 %v879_v37, %v1127_v60  ;;  %v549_v40 = vpop.xlane.xlu1 %548  ;;  %v881_v42 = vpop.eup %880 }
 0x236   : > { %882 = vrcp.f32 %v549_v40  ;;  %v583_v45 = vmul.f32 %v881_v42, %v1125_v59 }
 0x237   : > { %v785_v41 = vpack.c.bf16 %v590_v39, %v589_v38 }
 0x239   : > { %795 = vst [vmem:[%s1158_s14 + $0x20] sm:$0xff] %v785_v41   ;;  %v551_v44 = vpop.xlane.xlu2 %550 }
 0x23a   : > { %884 = vrcp.f32 %v551_v44 }
 0x23c   : > { %v883_v43 = vpop.eup %882 }
 0x23d   : > { %v584_v46 = vmul.f32 %v883_v43, %v1131_v0 }
 0x23f   : > { %v770_v47 = vpack.c.bf16 %v584_v46, %v583_v45 }
 0x240   : > { %v885_v49 = vpop.eup %884 }
 0x241   : > { %v553_v48 = vpop.xlane.xlu0 %552  ;;  %792 = vst [vmem:[%s1158_s14 + $0x8] sm:$0xff] %v770_v47   ;;  %v585_v51 = vmul.f32 %v885_v49, %v1134_v3 }
 0x242   : > { %886 = vrcp.f32 %v553_v48 }
 0x248   : > { %v887_v50 = vpop.eup %886 }
 0x249   : > { %v586_v52 = vmul.f32 %v887_v50, %v1139_v9  ;;  %v565_v57 = vpop.xlane.xlu0 %564 }
 0x24a   : > { %v555_v53 = vpop.xlane.xlu1 %554 }
 0x24b   : > { %v775_v54 = vpack.c.bf16 %v586_v52, %v585_v51  ;;  %888 = vrcp.f32 %v555_v53 }
 0x24d   : > { %793 = vst [vmem:[%s1158_s14 + $0x10] sm:$0xff] %v775_v54  }
 0x251   : > { %v557_v55 = vpop.xlane.xlu2 %556  ;;  %v889_v58 = vpop.eup %888 }
 0x252   : > { %890 = vrcp.f32 %v557_v55  ;;  %v567_v56 = vpop.xlane.xlu1 %566  ;;  %v587_v61 = vmul.f32 %v889_v58, %v1146_v19 }
 0x253   : > { %892 = vrcp.f32 %v567_v56 }
 0x254   : > { %894 = vrcp.f32 %v565_v57 }
 0x258   : > { %v891_v59 = vpop.eup %890 }
 0x259   : > { %v893_v60 = vpop.eup %892  ;;  %v588_v62 = vmul.f32 %v891_v59, %v867_v22  ;;  %v563_v63 = vpop.xlane.xlu2 %562 }
 0x25a   : > { %v593_v0 = vmul.f32 %v893_v60, %v869_v24  ;;  %896 = vrcp.f32 %v563_v63  ;;  %v895_v3 = vpop.eup %894 }
 0x25b   : > { %v780_v1 = vpack.c.bf16 %v588_v62, %v587_v61  ;;  %v592_v5 = vmul.f32 %v895_v3, %v1144_v16 }
 0x25c   : > { %v606_v2 = vpack.c.bf16 %v593_v0, %v593_v0 }
 0x25d   : > { %794 = vst [vmem:[%s1158_s14 + $0x18] sm:$0xff] %v780_v1  }
 0x25e   : > { %619 = vst [vmem:[%s1158_s14 + $0x30] sm:$0xf] %v606_v2 }
 0x260   : > { %v897_v4 = vpop.eup %896 }
 0x261   : > { %v591_v6 = vmul.f32 %v897_v4, %v1151_v25  ;;  %627 = sbr.rel (!%p1044_p5) target bundleno = 645 (0x285), region = 44 }
 0x263   : > { %v790_v7 = vpack.c.bf16 %v592_v5, %v591_v6 }
 0x265   : > { %796 = vst [vmem:[%s1158_s14 + $0x28] sm:$0xff] %v790_v7  }
 0x266   : > { %s1253_s16 = smov (!%p630_p11, %s629_s16), 13 }
 0x267   : > { %s748_s17 = sshll.u32 %s1253_s16, 2 }
 0x268   : > { %s633_s23 = ssub.s32 52, %s748_s17 }
 0x269   : > { %s634_s25 = sshll.u32 %s633_s23, 4 }
 0x26a   : > { %635 = vsyncadd %s1178_s15, %s634_s25  ;;  %p1187_p12 = scmp.ne.s32.totalorder %s748_s17, 0  ;;  %s761_s28 = smul.u32 52, %s1027_s22 }
 0x26b   : > { %s640_s30 = sshll.u32 %s1158_s14, 4  ;;  %s752_s7 = sshll.u32 %s1253_s16, 6  ;;  %s1197_s30 = int_to_ptr.vmem [resolvable:$true] %s640_s30 }
 0x26c   : > { %s638_s9 = scalar_lea.hbm %s1244_s5, %s761_s28  ;;  %s898_s11 = sshra.s32 %s1197_s30, 4  ;;  %s899_s11 = int_to_ptr.vmem [resolvable:$true] %s898_s11 }
 0x26d   : > { %s642_s10 = sshll.u32 %s638_s9, 4  ;;  %s900_s12 = sshrl.u32 %s752_s7, 4  ;;  %s1199_s10 = int_to_ptr.hbm [resolvable:$true] %s642_s10 }
 0x26e   : > { %s905_s13 = scalar_lea.vmem %s899_s11, %s900_s12  ;;  %s973_s22 = smov [#allocation2]  }
 0x26f   : > { %p906_p13 = scmp.ne.s32.totalorder %s899_s11, %s905_s13  ;;  %s909_s14 = scalar_lea.vmem %s973_s22, 104 }
 0x270   : > { %p911_p2 = scmp.lt.s32.totalorder %s909_s14, %s905_s13 }
 0x271   : > { %p907_p0 = pnand %p906_p13, %p1187_p12 }
 0x273   : > { %p908_p1 = pneg %p907_p0 }
 0x275   : > { %p913_p3 = pnand %p911_p2, %p908_p1 }
 0x277   : > { %916 = shalt.err (!%p913_p3)
}
 0x278   : > { %s917_s17 = sshra.s32 %s1199_s10, 4  ;;  %s928_s6 = scalar_lea.hbm %s1244_s5, 100  ;;  %s918_s17 = int_to_ptr.hbm [resolvable:$true] %s917_s17 }
 0x279   : > { %s924_s23 = scalar_lea.hbm %s918_s17, %s900_s12  ;;  %p929_p8 = scmp.lt.s32.totalorder %s918_s17, %s1244_s5 }
 0x27a   : > { %p925_p4 = scmp.ne.s32.totalorder %s918_s17, %s924_s23  ;;  %p930_p9 = scmp.lt.s32.totalorder %s928_s6, %s924_s23 }
 0x27c   : > { %p926_p5 = pnand %p925_p4, %p1187_p12  ;;  %p931_p10 = por %p930_p9, %p929_p8 }
 0x27e   : > { %p927_p7 = pneg %p926_p5 }
 0x280   : > { %p932_p11 = pnand %p931_p10, %p927_p7 }
 0x282   : > { %935 = shalt.err (!%p932_p11)
}
 0x283   : > { %s974_s11 = smov 64   ;;  %s975_s12 = smov 4  }
 0x284   : > { %648 = dma.vmem_to_hbm [thread:$0]  (%p1187_p12), %s1197_s30, %s752_s7, %s1199_s10, %s1178_s15, %s974_s11, %s974_s11, %s975_s12  }
 0x285 PF: > { %p809_p13 = scmp.ge.s32.totalorder %s971_s21, 2  ;;  %s657_s13 = sand.u32 1, %s959_s18  }
 0x286   : > { %s658_s22 = scalar_lea.sflag [#allocation3], %s657_s13 }
 0x287   : > { %p806_p0 = pnand %p809_p13, %p1048_p6 }
 0x289   : > { %p807_p1 = pneg %p806_p0 }
 0x28b   : > { %954 = dma.done.wait (%p807_p1), %s658_s22, 832  }
 0x28c   : > { %956 = vsyncadd (%p807_p1), %s658_s22, 4294966464  ;;  %p15_p2 = scmp.ge.s32.totalorder %s1031_s24, 4   ;;  %s1248_s18 = smov %s963_s19 }
 0x28d   : > { %s1249_s19 = smov %s967_s20  ;;  %s1250_s20 = smov %s1042_s27 }
 0x28e   : > { %s1251_s21 = smov %s1031_s24  ;;  %17 = sbr.rel (!%p15_p2) target bundleno = 3 (0x3), region = 75 }
 0x293   :  { %664 = vsyncpa [#allocation3], 1 }
 0x294   :  { %666 = vsyncpa [#allocation3 + $0x1], 1 }

</bundles_post_ra>
